<compile_context>
chip_gen: v6e
topology: v6e:2x2x1
jax: 0.10.0
libtpu: 0.0.40
codegen_flags: <defaults>
</compile_context>

<pallas_src>
import numpy as np
import jax
import jax.numpy as jnp
from jax import lax
from jax.experimental import pallas as pl
from jax.experimental.pallas import tpu as pltpu


def _round_up(x, m):
    return ((x + m - 1) // m) * m


# ---------------------------------------------------------------------------
# Kernel A: fused  mask-multiply + hidden-dim row-mean + span max-pool
# ---------------------------------------------------------------------------
def _make_pool_kernel(S, H, T, W, Sp):
    neg = jnp.finfo(jnp.float32).min

    def kernel(lo_ref, klo_ref, khi_ref,        # scalar prefetch (SMEM, [B*T])
               bert_ref, mask_ref,              # (1,S,H) f32 / (1,S,1) f32
               tok_ref, mean_ref,               # (1,T,H) bf16 / (1,S,1) f32
               x_scratch):                      # VMEM (Sp,H) f32
        b = pl.program_id(0)
        x = bert_ref[0] * mask_ref[0]                       # [S,H] masked, f32
        mean_ref[0] = jnp.mean(x, axis=-1, keepdims=True)   # [S,1]
        x_scratch[pl.ds(0, S), :] = x
        if Sp > S:                                          # zero padded tail
            x_scratch[pl.ds(S, Sp - S), :] = jnp.zeros((Sp - S, H), jnp.float32)

        kio = lax.broadcasted_iota(jnp.int32, (W, 1), 0)
        rows = []
        for t in range(T):                                  # static unroll
            idx = b * T + t
            lo = pl.multiple_of(lo_ref[idx], 8)             # 8-aligned span start
            klo = klo_ref[idx]
            khi = khi_ref[idx]
            window = x_scratch[pl.ds(lo, W), :]             # [W,H]
            sel = (kio >= klo) & (kio <= khi)
            pooled = jnp.max(jnp.where(sel, window, neg), axis=0, keepdims=True)
            pooled = jnp.where(khi >= klo, pooled, 0.0)     # pad token -> 0
            rows.append(pooled)
        tok_ref[0] = jnp.concatenate(rows, axis=0).astype(tok_ref.dtype)

    return kernel


def fused_mask_pool(bert_output, mask3, lo, klo, khi, T, W):
    B, S, H = bert_output.shape
    Sp = 8 * ((S - 1) // 8) + W        # scratch rows: max aligned start + window
    kernel = _make_pool_kernel(S, H, T, W, Sp)
    tok, mean = pl.pallas_call(
        kernel,
        out_shape=(jax.ShapeDtypeStruct((B, T, H), jnp.bfloat16),
                   jax.ShapeDtypeStruct((B, S, 1), jnp.float32)),
        grid_spec=pltpu.PrefetchScalarGridSpec(
            num_scalar_prefetch=3,
            grid=(B,),
            in_specs=[pl.BlockSpec((1, S, H), lambda b, *_: (b, 0, 0)),
                      pl.BlockSpec((1, S, 1), lambda b, *_: (b, 0, 0))],
            out_specs=(pl.BlockSpec((1, T, H), lambda b, *_: (b, 0, 0)),
                       pl.BlockSpec((1, S, 1), lambda b, *_: (b, 0, 0))),
            scratch_shapes=[pltpu.VMEM((Sp, H), jnp.float32)]),
        compiler_params=pltpu.CompilerParams(
            dimension_semantics=("parallel",)),
    )(lo, klo, khi, bert_output, mask3)
    return tok, mean[..., 0]                    # [B,T,H] bf16, [B,S] f32


# ---------------------------------------------------------------------------
# Kernel B1: token_input @ W_tok with B collapsed into the MXU M dim
# ---------------------------------------------------------------------------
def _matmul_kernel(x_ref, w_ref, o_ref):
    o_ref[...] = jnp.dot(x_ref[...], w_ref[...],
                         preferred_element_type=jnp.float32)


def token_matmul(tok2d, w_tok):
    Mp, H = tok2d.shape
    Rp = w_tok.shape[1]
    TM = Mp if Mp <= 512 else 256
    return pl.pallas_call(
        _matmul_kernel,
        out_shape=jax.ShapeDtypeStruct((Mp, Rp), jnp.float32),
        grid=(Mp // TM,),
        in_specs=[pl.BlockSpec((TM, H), lambda i: (i, 0)),
                  pl.BlockSpec((H, Rp), lambda i: (0, 0))],   # W_tok resident
        out_specs=pl.BlockSpec((TM, Rp), lambda i: (i, 0)),
        compiler_params=pltpu.CompilerParams(
            dimension_semantics=("parallel",)),
    )(tok2d, w_tok)


# ---------------------------------------------------------------------------
# Kernel B2: + CLS projection + arg_seq contraction (A=5) on the VPU
# ---------------------------------------------------------------------------
def _make_arg_kernel(A):
    def kernel(arg_ref, base_ref, cls_ref, warg_ref, o_ref):
        base = base_ref[0] + cls_ref[0]            # [T,Rp] + [1,Rp]
        arg = arg_ref[0]                           # [N,T,A]
        w = warg_ref[...]                          # [A,Rp]
        out = base[None, :, :]
        for a in range(A):                         # K=5 contraction: VPU FMAs
            out = out + arg[:, :, a:a + 1] * w[a:a + 1, :][None, :, :]
        o_ref[0] = out
    return kernel


def arg_fnn(arg_seq, base3, cls_proj3, w_arg):
    B, N, T, A = arg_seq.shape
    Rp = w_arg.shape[1]
    return pl.pallas_call(
        _make_arg_kernel(A),
        out_shape=jax.ShapeDtypeStruct((B, N, T, Rp), jnp.float32),
        grid=(B,),
        in_specs=[pl.BlockSpec((1, N, T, A), lambda b: (b, 0, 0, 0)),
                  pl.BlockSpec((1, T, Rp), lambda b: (b, 0, 0)),
                  pl.BlockSpec((1, 1, Rp), lambda b: (b, 0, 0)),
                  pl.BlockSpec((A, Rp), lambda b: (0, 0))],
        out_specs=pl.BlockSpec((1, N, T, Rp), lambda b: (b, 0, 0, 0)),
        compiler_params=pltpu.CompilerParams(
            dimension_semantics=("parallel",)),
    )(arg_seq, base3, cls_proj3, w_arg)


# ---------------------------------------------------------------------------
# Host-side span tables (token_map is host data) + tiny plain-JAX glue
# ---------------------------------------------------------------------------
def build_span_tables(token_map, B, T):
    lmax = 1
    for spans in token_map:
        for span in spans:
            lmax = max(lmax, int(span[-1]) - int(span[0]) + 1)
    W = _round_up(lmax + 7, 8)          # 8-aligned window covers any span
    lo = np.zeros((B, T), np.int32)
    klo = np.ones((B, T), np.int32)     # pad tokens: klo=1 > khi=0 -> output 0
    khi = np.zeros((B, T), np.int32)
    token_len = np.zeros((B,), np.int32)
    for i, spans in enumerate(token_map):
        token_len[i] = len(spans)
        for t, span in enumerate(spans):
            s0, s1 = int(span[0]), int(span[-1])
            base = (s0 // 8) * 8
            lo[i, t] = base
            klo[i, t] = s0 - base
            khi[i, t] = s1 - base
    return (jnp.asarray(lo.reshape(-1)), jnp.asarray(klo.reshape(-1)),
            jnp.asarray(khi.reshape(-1)), jnp.asarray(token_len), W)


def mean_cls(rowmean, token_len, H):
    """Reproduces the reference exactly: CLS_embed[i, 1:token_len] gets the
    mean-over-hidden of wordpiece positions 1..token_len-1 (token index used
    as a hidden-axis index, exactly as in the PyTorch code)."""
    B, S = rowmean.shape
    if S < H:
        rowmean = jnp.pad(rowmean, ((0, 0), (0, H - S)))
    src = rowmean[:, :H]
    j = jnp.arange(H)[None, :]
    valid = (j >= 1) & (j < token_len[:, None])
    return jnp.where(valid, src, 0.0)                        # [B,H] f32


def base_model_forward(bert_output, input_mask, token_map, arg_seq, w, b):
    B, S, H = bert_output.shape
    _, N, T, A = arg_seq.shape
    R = w.shape[1]
    Rp = _round_up(R, 128)

    lo, klo, khi, token_len, W = build_span_tables(token_map, B, T)
    mask3 = input_mask.astype(jnp.float32)[..., None]        # [B,S,1]

    # Kernel A: single f32 pass over bert_output; masked tensor never hits HBM.
    token_input, rowmean = fused_mask_pool(bert_output, mask3, lo, klo, khi, T, W)

    # Tiny plain-JAX glue for the reference's odd CLS-mean semantics.
    cls_embed = mean_cls(rowmean, token_len, H)               # [B,H] f32

    # FNN weight split by feature group [token(H) | CLS(H) | arg(A)], 128 lanes.
    w_tok = jnp.pad(w[:H], ((0, 0), (0, Rp - R))).astype(jnp.bfloat16)
    w_cls = jnp.pad(w[H:2 * H], ((0, 0), (0, Rp - R)))
    w_arg = jnp.pad(w[2 * H:2 * H + A], ((0, 0), (0, Rp - R)))
    bias = jnp.pad(b, ((0, 0), (0, Rp - R)))

    # Hoisted CLS projection: one [B,H]@[H,Rp] matmul + bias (only B rows).
    cls_proj3 = (cls_embed @ w_cls + bias)[:, None, :]        # [B,1,Rp] f32

    # Kernel B1: B collapsed into the M dim of the MXU matmul.
    Mtot = B * T
    Mp = _round_up(Mtot, 8) if Mtot <= 512 else _round_up(Mtot, 256)
    tok2d = token_input.reshape(Mtot, H)
    if Mp > Mtot:
        tok2d = jnp.pad(tok2d, ((0, Mp - Mtot), (0, 0)))
    base3 = token_matmul(tok2d, w_tok)[:Mtot].reshape(B, T, Rp)

    # Kernel B2: per-batch slab, N collapsed into the block, A=5 on the VPU.
    logits_p = arg_fnn(arg_seq, base3, cls_proj3, w_arg)      # [B,N,T,Rp]
    return logits_p[..., :R]


# ---------------------------------------------------------------------------
# Pure numpy reference (mirrors the PyTorch module, f32)
# ---------------------------------------------------------------------------
def reference_forward_numpy(bert_output, input_mask, token_map, arg_seq, w, b):
    B, S, H = bert_output.shape
    _, N, T, A = arg_seq.shape
    masked = bert_output * input_mask[..., None]
    token_input = np.zeros((B, T, H), np.float32)
    for i in range(B):
        for j, span in enumerate(token_map[i]):
            if len(span) == 1:
                token_input[i, j] = masked[i, span[0]]
            else:
                token_input[i, j] = masked[i, span[0]:span[-1] + 1].max(0)
    cls = np.zeros((B, H), np.float32)
    for i in range(B):
        tl = len(token_map[i])
        cls[i, 1:tl] = masked[i, 1:tl].mean(1)
    temp = np.concatenate(
        [token_input, np.broadcast_to(cls[:, None, :], (B, T, H))], -1)
    new_temp = np.broadcast_to(temp[:, None], (B, N, T, 2 * H))
    final = np.concatenate([new_temp, arg_seq], -1)
    logits = final.reshape(-1, 2 * H + A) @ w + b
    return logits.reshape(B, N, T, -1)


# ---------------------------------------------------------------------------
if __name__ == "__main__":
    B, S, H = 2, 16, 32          # batch, wordpiece seq, hidden_size
    N, T = 4, 8                  # seq_num (crf_mask dim 1), max_token_len
    A = 5                        # arg_seq feature width
    R = 6                        # rel_label
    F = 2 * H + A                # pos_result == False

    key = jax.random.PRNGKey(0)
    k1, k2, k3, k4 = jax.random.split(key, 4)

    # stand-in for the external BERT encoder output (model(...)[0])
    bert_output = jax.random.normal(k1, (B, S, H), jnp.float32)

    input_mask = np.zeros((B, S), np.float32)
    input_mask[0, :12] = 1.0
    input_mask[1, :10] = 1.0
    input_mask = jnp.asarray(input_mask)

    # deterministic ragged token_map (wordpiece -> token spans)
    token_map = [
        [[0], [1], [2, 3], [4], [5, 6, 7], [8], [9], [10]],   # 8 tokens
        [[0], [1, 2], [3], [4], [5], [6, 7, 8]],              # 6 tokens
    ]

    arg_seq = jax.random.normal(k2, (B, N, T, A), jnp.float32)

    # deterministic FNN parameters (Linear(F -> R))
    bound = 1.0 / np.sqrt(F)
    w = jax.random.uniform(k3, (F, R), jnp.float32, -bound, bound)
    b = jax.random.uniform(k4, (1, R), jnp.float32, -bound, bound)

    logits = base_model_forward(bert_output, input_mask, token_map, arg_seq, w, b)
    logits = jax.block_until_ready(logits)

    assert logits.shape == (B, N, T, R), logits.shape
    assert bool(jnp.all(jnp.isfinite(logits)))

    # correctness check vs. the reference semantics
    ref = reference_forward_numpy(
        np.asarray(bert_output), np.asarray(input_mask), token_map,
        np.asarray(arg_seq), np.asarray(w), np.asarray(b))
    max_err = float(np.max(np.abs(np.asarray(logits, np.float32) - ref)))
    assert max_err < 0.1, f"max abs error {max_err}"

    print("KERNEL_OK")
</pallas_src>

<mosaic_0001>
module attributes {stable_mosaic.version = 11 : i64} {
  func.func @kernel(%arg0: i32, %arg1: memref<16xi32, #tpu.memory_space<smem>>, %arg2: memref<16xi32, #tpu.memory_space<smem>>, %arg3: memref<16xi32, #tpu.memory_space<smem>>, %arg4: memref<1x16x32xf32, #tpu.memory_space<vmem>>, %arg5: memref<1x16x1xf32, #tpu.memory_space<vmem>>, %arg6: memref<1x8x32xbf16, #tpu.memory_space<vmem>>, %arg7: memref<1x16x1xf32, #tpu.memory_space<vmem>>, %arg8: memref<24x32xf32, #tpu.memory_space<vmem>>) attributes {dimension_semantics = [#tpu.dimension_semantics<parallel>], iteration_bounds = array<i64: 2>, scalar_prefetch = 3 : i64, scratch_operands = 1 : i64, tpu.core_type = #tpu.core_type<tc>, window_params = [{transform_indices = @transform_0, window_bounds = array<i64: 1, 16, 32>}, {transform_indices = @transform_1, window_bounds = array<i64: 1, 16, 1>}, {transform_indices = @transform_2, window_bounds = array<i64: 1, 8, 32>}, {transform_indices = @transform_3, window_bounds = array<i64: 1, 16, 1>}]} {
    %c0 = arith.constant 0 : index
    %c0_0 = arith.constant 0 : index
    %c0_1 = arith.constant 0 : index
    %0 = vector.load %arg4[%c0, %c0_0, %c0_1] : memref<1x16x32xf32, #tpu.memory_space<vmem>>, vector<1x16x32xf32>
    %1 = vector.shape_cast %0 : vector<1x16x32xf32> to vector<16x32xf32>
    %c0_2 = arith.constant 0 : index
    %c0_3 = arith.constant 0 : index
    %c0_4 = arith.constant 0 : index
    %2 = vector.load %arg5[%c0_2, %c0_3, %c0_4] : memref<1x16x1xf32, #tpu.memory_space<vmem>>, vector<1x16x1xf32>
    %3 = vector.shape_cast %2 : vector<1x16x1xf32> to vector<16x1xf32>
    %4 = vector.broadcast %3 : vector<16x1xf32> to vector<16x32xf32>
    %5 = arith.mulf %1, %4 : vector<16x32xf32>
    %cst = arith.constant dense<0.000000e+00> : vector<16xf32>
    %6 = vector.multi_reduction <add>, %5, %cst [1] : vector<16x32xf32> to vector<16xf32>
    %7 = vector.shape_cast %6 : vector<16xf32> to vector<16x1xf32>
    %cst_5 = arith.constant 3.200000e+01 : f32
    %8 = vector.broadcast %cst_5 : f32 to vector<16x1xf32>
    %9 = arith.divf %7, %8 : vector<16x1xf32>
    %c0_6 = arith.constant 0 : index
    %c0_7 = arith.constant 0 : index
    %c0_8 = arith.constant 0 : index
    %10 = vector.load %arg7[%c0_6, %c0_7, %c0_8] : memref<1x16x1xf32, #tpu.memory_space<vmem>>, vector<1x16x1xf32>
    %11 = vector.shape_cast %10 : vector<1x16x1xf32> to vector<16x1xf32>
    %12 = vector.shape_cast %9 : vector<16x1xf32> to vector<1x16x1xf32>
    tpu.vector_store %arg7[%c0_6, %c0_7, %c0_8], %12 {strides = array<i32>} : memref<1x16x1xf32, #tpu.memory_space<vmem>>, vector<1x16x1xf32>,
    %c0_9 = arith.constant 0 : index
    %c0_10 = arith.constant 0 : index
    %13 = vector.load %arg8[%c0_9, %c0_10] : memref<24x32xf32, #tpu.memory_space<vmem>>, vector<16x32xf32>
    tpu.vector_store %arg8[%c0_9, %c0_10], %5 {strides = array<i32>} : memref<24x32xf32, #tpu.memory_space<vmem>>, vector<16x32xf32>,
    %cst_11 = arith.constant 0.000000e+00 : f32
    %14 = vector.broadcast %cst_11 : f32 to vector<8x32xf32>
    %c16 = arith.constant 16 : index
    %c0_12 = arith.constant 0 : index
    %15 = vector.load %arg8[%c16, %c0_12] : memref<24x32xf32, #tpu.memory_space<vmem>>, vector<8x32xf32>
    tpu.vector_store %arg8[%c16, %c0_12], %14 {strides = array<i32>} : memref<24x32xf32, #tpu.memory_space<vmem>>, vector<8x32xf32>,
    %16 = tpu.iota {dimensions = array<i32: 0>} : vector<16x1xi32>
    %c8_i32 = arith.constant 8 : i32
    %17 = arith.muli %arg0, %c8_i32 : i32
    %c0_i32 = arith.constant 0 : i32
    %18 = arith.addi %17, %c0_i32 : i32
    %19 = arith.index_cast %18 : i32 to index
    %20 = memref.load %arg1[%19] : memref<16xi32, #tpu.memory_space<smem>>
    %21 = tpu.assume_multiple %20, 8 : i32
    %22 = arith.index_cast %18 : i32 to index
    %23 = memref.load %arg2[%22] : memref<16xi32, #tpu.memory_space<smem>>
    %24 = arith.index_cast %18 : i32 to index
    %25 = memref.load %arg3[%24] : memref<16xi32, #tpu.memory_space<smem>>
    %26 = arith.index_cast %21 : i32 to index
    %c0_13 = arith.constant 0 : index
    %27 = vector.load %arg8[%26, %c0_13] : memref<24x32xf32, #tpu.memory_space<vmem>>, vector<16x32xf32>
    %28 = vector.broadcast %23 : i32 to vector<16x1xi32>
    %29 = arith.cmpi sge, %16, %28 : vector<16x1xi32>
    %30 = vector.broadcast %25 : i32 to vector<16x1xi32>
    %31 = arith.cmpi sle, %16, %30 : vector<16x1xi32>
    %32 = arith.andi %29, %31 : vector<16x1xi1>
    %cst_14 = arith.constant -3.40282347E+38 : f32
    %33 = vector.shape_cast %32 : vector<16x1xi1> to vector<16x1xi1>
    %34 = vector.broadcast %33 : vector<16x1xi1> to vector<16x32xi1>
    %35 = vector.broadcast %cst_14 : f32 to vector<16x32xf32>
    %36 = arith.select %34, %27, %35 : vector<16x32xi1>, vector<16x32xf32>
    %cst_15 = arith.constant dense<0xFF800000> : vector<32xf32>
    %37 = vector.multi_reduction <maximumf>, %36, %cst_15 [0] : vector<16x32xf32> to vector<32xf32>
    %38 = vector.shape_cast %37 : vector<32xf32> to vector<1x32xf32>
    %39 = arith.cmpi sge, %25, %23 : i32
    %cst_16 = arith.constant 0.000000e+00 : f32
    %40 = vector.broadcast %cst_16 : f32 to vector<1x32xf32>
    %41 = arith.select %39, %38, %40 : vector<1x32xf32>
    %c8_i32_17 = arith.constant 8 : i32
    %42 = arith.muli %arg0, %c8_i32_17 : i32
    %c1_i32 = arith.constant 1 : i32
    %43 = arith.addi %42, %c1_i32 : i32
    %44 = arith.index_cast %43 : i32 to index
    %45 = memref.load %arg1[%44] : memref<16xi32, #tpu.memory_space<smem>>
    %46 = tpu.assume_multiple %45, 8 : i32
    %47 = arith.index_cast %43 : i32 to index
    %48 = memref.load %arg2[%47] : memref<16xi32, #tpu.memory_space<smem>>
    %49 = arith.index_cast %43 : i32 to index
    %50 = memref.load %arg3[%49] : memref<16xi32, #tpu.memory_space<smem>>
    %51 = arith.index_cast %46 : i32 to index
    %c0_18 = arith.constant 0 : index
    %52 = vector.load %arg8[%51, %c0_18] : memref<24x32xf32, #tpu.memory_space<vmem>>, vector<16x32xf32>
    %53 = vector.broadcast %48 : i32 to vector<16x1xi32>
    %54 = arith.cmpi sge, %16, %53 : vector<16x1xi32>
    %55 = vector.broadcast %50 : i32 to vector<16x1xi32>
    %56 = arith.cmpi sle, %16, %55 : vector<16x1xi32>
    %57 = arith.andi %54, %56 : vector<16x1xi1>
    %cst_19 = arith.constant -3.40282347E+38 : f32
    %58 = vector.shape_cast %57 : vector<16x1xi1> to vector<16x1xi1>
    %59 = vector.broadcast %58 : vector<16x1xi1> to vector<16x32xi1>
    %60 = vector.broadcast %cst_19 : f32 to vector<16x32xf32>
    %61 = arith.select %59, %52, %60 : vector<16x32xi1>, vector<16x32xf32>
    %cst_20 = arith.constant dense<0xFF800000> : vector<32xf32>
    %62 = vector.multi_reduction <maximumf>, %61, %cst_20 [0] : vector<16x32xf32> to vector<32xf32>
    %63 = vector.shape_cast %62 : vector<32xf32> to vector<1x32xf32>
    %64 = arith.cmpi sge, %50, %48 : i32
    %cst_21 = arith.constant 0.000000e+00 : f32
    %65 = vector.broadcast %cst_21 : f32 to vector<1x32xf32>
    %66 = arith.select %64, %63, %65 : vector<1x32xf32>
    %c8_i32_22 = arith.constant 8 : i32
    %67 = arith.muli %arg0, %c8_i32_22 : i32
    %c2_i32 = arith.constant 2 : i32
    %68 = arith.addi %67, %c2_i32 : i32
    %69 = arith.index_cast %68 : i32 to index
    %70 = memref.load %arg1[%69] : memref<16xi32, #tpu.memory_space<smem>>
    %71 = tpu.assume_multiple %70, 8 : i32
    %72 = arith.index_cast %68 : i32 to index
    %73 = memref.load %arg2[%72] : memref<16xi32, #tpu.memory_space<smem>>
    %74 = arith.index_cast %68 : i32 to index
    %75 = memref.load %arg3[%74] : memref<16xi32, #tpu.memory_space<smem>>
    %76 = arith.index_cast %71 : i32 to index
    %c0_23 = arith.constant 0 : index
    %77 = vector.load %arg8[%76, %c0_23] : memref<24x32xf32, #tpu.memory_space<vmem>>, vector<16x32xf32>
    %78 = vector.broadcast %73 : i32 to vector<16x1xi32>
    %79 = arith.cmpi sge, %16, %78 : vector<16x1xi32>
    %80 = vector.broadcast %75 : i32 to vector<16x1xi32>
    %81 = arith.cmpi sle, %16, %80 : vector<16x1xi32>
    %82 = arith.andi %79, %81 : vector<16x1xi1>
    %cst_24 = arith.constant -3.40282347E+38 : f32
    %83 = vector.shape_cast %82 : vector<16x1xi1> to vector<16x1xi1>
    %84 = vector.broadcast %83 : vector<16x1xi1> to vector<16x32xi1>
    %85 = vector.broadcast %cst_24 : f32 to vector<16x32xf32>
    %86 = arith.select %84, %77, %85 : vector<16x32xi1>, vector<16x32xf32>
    %cst_25 = arith.constant dense<0xFF800000> : vector<32xf32>
    %87 = vector.multi_reduction <maximumf>, %86, %cst_25 [0] : vector<16x32xf32> to vector<32xf32>
    %88 = vector.shape_cast %87 : vector<32xf32> to vector<1x32xf32>
    %89 = arith.cmpi sge, %75, %73 : i32
    %cst_26 = arith.constant 0.000000e+00 : f32
    %90 = vector.broadcast %cst_26 : f32 to vector<1x32xf32>
    %91 = arith.select %89, %88, %90 : vector<1x32xf32>
    %c8_i32_27 = arith.constant 8 : i32
    %92 = arith.muli %arg0, %c8_i32_27 : i32
    %c3_i32 = arith.constant 3 : i32
    %93 = arith.addi %92, %c3_i32 : i32
    %94 = arith.index_cast %93 : i32 to index
    %95 = memref.load %arg1[%94] : memref<16xi32, #tpu.memory_space<smem>>
    %96 = tpu.assume_multiple %95, 8 : i32
    %97 = arith.index_cast %93 : i32 to index
    %98 = memref.load %arg2[%97] : memref<16xi32, #tpu.memory_space<smem>>
    %99 = arith.index_cast %93 : i32 to index
    %100 = memref.load %arg3[%99] : memref<16xi32, #tpu.memory_space<smem>>
    %101 = arith.index_cast %96 : i32 to index
    %c0_28 = arith.constant 0 : index
    %102 = vector.load %arg8[%101, %c0_28] : memref<24x32xf32, #tpu.memory_space<vmem>>, vector<16x32xf32>
    %103 = vector.broadcast %98 : i32 to vector<16x1xi32>
    %104 = arith.cmpi sge, %16, %103 : vector<16x1xi32>
    %105 = vector.broadcast %100 : i32 to vector<16x1xi32>
    %106 = arith.cmpi sle, %16, %105 : vector<16x1xi32>
    %107 = arith.andi %104, %106 : vector<16x1xi1>
    %cst_29 = arith.constant -3.40282347E+38 : f32
    %108 = vector.shape_cast %107 : vector<16x1xi1> to vector<16x1xi1>
    %109 = vector.broadcast %108 : vector<16x1xi1> to vector<16x32xi1>
    %110 = vector.broadcast %cst_29 : f32 to vector<16x32xf32>
    %111 = arith.select %109, %102, %110 : vector<16x32xi1>, vector<16x32xf32>
    %cst_30 = arith.constant dense<0xFF800000> : vector<32xf32>
    %112 = vector.multi_reduction <maximumf>, %111, %cst_30 [0] : vector<16x32xf32> to vector<32xf32>
    %113 = vector.shape_cast %112 : vector<32xf32> to vector<1x32xf32>
    %114 = arith.cmpi sge, %100, %98 : i32
    %cst_31 = arith.constant 0.000000e+00 : f32
    %115 = vector.broadcast %cst_31 : f32 to vector<1x32xf32>
    %116 = arith.select %114, %113, %115 : vector<1x32xf32>
    %c8_i32_32 = arith.constant 8 : i32
    %117 = arith.muli %arg0, %c8_i32_32 : i32
    %c4_i32 = arith.constant 4 : i32
    %118 = arith.addi %117, %c4_i32 : i32
    %119 = arith.index_cast %118 : i32 to index
    %120 = memref.load %arg1[%119] : memref<16xi32, #tpu.memory_space<smem>>
    %121 = tpu.assume_multiple %120, 8 : i32
    %122 = arith.index_cast %118 : i32 to index
    %123 = memref.load %arg2[%122] : memref<16xi32, #tpu.memory_space<smem>>
    %124 = arith.index_cast %118 : i32 to index
    %125 = memref.load %arg3[%124] : memref<16xi32, #tpu.memory_space<smem>>
    %126 = arith.index_cast %121 : i32 to index
    %c0_33 = arith.constant 0 : index
    %127 = vector.load %arg8[%126, %c0_33] : memref<24x32xf32, #tpu.memory_space<vmem>>, vector<16x32xf32>
    %128 = vector.broadcast %123 : i32 to vector<16x1xi32>
    %129 = arith.cmpi sge, %16, %128 : vector<16x1xi32>
    %130 = vector.broadcast %125 : i32 to vector<16x1xi32>
    %131 = arith.cmpi sle, %16, %130 : vector<16x1xi32>
    %132 = arith.andi %129, %131 : vector<16x1xi1>
    %cst_34 = arith.constant -3.40282347E+38 : f32
    %133 = vector.shape_cast %132 : vector<16x1xi1> to vector<16x1xi1>
    %134 = vector.broadcast %133 : vector<16x1xi1> to vector<16x32xi1>
    %135 = vector.broadcast %cst_34 : f32 to vector<16x32xf32>
    %136 = arith.select %134, %127, %135 : vector<16x32xi1>, vector<16x32xf32>
    %cst_35 = arith.constant dense<0xFF800000> : vector<32xf32>
    %137 = vector.multi_reduction <maximumf>, %136, %cst_35 [0] : vector<16x32xf32> to vector<32xf32>
    %138 = vector.shape_cast %137 : vector<32xf32> to vector<1x32xf32>
    %139 = arith.cmpi sge, %125, %123 : i32
    %cst_36 = arith.constant 0.000000e+00 : f32
    %140 = vector.broadcast %cst_36 : f32 to vector<1x32xf32>
    %141 = arith.select %139, %138, %140 : vector<1x32xf32>
    %c8_i32_37 = arith.constant 8 : i32
    %142 = arith.muli %arg0, %c8_i32_37 : i32
    %c5_i32 = arith.constant 5 : i32
    %143 = arith.addi %142, %c5_i32 : i32
    %144 = arith.index_cast %143 : i32 to index
    %145 = memref.load %arg1[%144] : memref<16xi32, #tpu.memory_space<smem>>
    %146 = tpu.assume_multiple %145, 8 : i32
    %147 = arith.index_cast %143 : i32 to index
    %148 = memref.load %arg2[%147] : memref<16xi32, #tpu.memory_space<smem>>
    %149 = arith.index_cast %143 : i32 to index
    %150 = memref.load %arg3[%149] : memref<16xi32, #tpu.memory_space<smem>>
    %151 = arith.index_cast %146 : i32 to index
    %c0_38 = arith.constant 0 : index
    %152 = vector.load %arg8[%151, %c0_38] : memref<24x32xf32, #tpu.memory_space<vmem>>, vector<16x32xf32>
    %153 = vector.broadcast %148 : i32 to vector<16x1xi32>
    %154 = arith.cmpi sge, %16, %153 : vector<16x1xi32>
    %155 = vector.broadcast %150 : i32 to vector<16x1xi32>
    %156 = arith.cmpi sle, %16, %155 : vector<16x1xi32>
    %157 = arith.andi %154, %156 : vector<16x1xi1>
    %cst_39 = arith.constant -3.40282347E+38 : f32
    %158 = vector.shape_cast %157 : vector<16x1xi1> to vector<16x1xi1>
    %159 = vector.broadcast %158 : vector<16x1xi1> to vector<16x32xi1>
    %160 = vector.broadcast %cst_39 : f32 to vector<16x32xf32>
    %161 = arith.select %159, %152, %160 : vector<16x32xi1>, vector<16x32xf32>
    %cst_40 = arith.constant dense<0xFF800000> : vector<32xf32>
    %162 = vector.multi_reduction <maximumf>, %161, %cst_40 [0] : vector<16x32xf32> to vector<32xf32>
    %163 = vector.shape_cast %162 : vector<32xf32> to vector<1x32xf32>
    %164 = arith.cmpi sge, %150, %148 : i32
    %cst_41 = arith.constant 0.000000e+00 : f32
    %165 = vector.broadcast %cst_41 : f32 to vector<1x32xf32>
    %166 = arith.select %164, %163, %165 : vector<1x32xf32>
    %c8_i32_42 = arith.constant 8 : i32
    %167 = arith.muli %arg0, %c8_i32_42 : i32
    %c6_i32 = arith.constant 6 : i32
    %168 = arith.addi %167, %c6_i32 : i32
    %169 = arith.index_cast %168 : i32 to index
    %170 = memref.load %arg1[%169] : memref<16xi32, #tpu.memory_space<smem>>
    %171 = tpu.assume_multiple %170, 8 : i32
    %172 = arith.index_cast %168 : i32 to index
    %173 = memref.load %arg2[%172] : memref<16xi32, #tpu.memory_space<smem>>
    %174 = arith.index_cast %168 : i32 to index
    %175 = memref.load %arg3[%174] : memref<16xi32, #tpu.memory_space<smem>>
    %176 = arith.index_cast %171 : i32 to index
    %c0_43 = arith.constant 0 : index
    %177 = vector.load %arg8[%176, %c0_43] : memref<24x32xf32, #tpu.memory_space<vmem>>, vector<16x32xf32>
    %178 = vector.broadcast %173 : i32 to vector<16x1xi32>
    %179 = arith.cmpi sge, %16, %178 : vector<16x1xi32>
    %180 = vector.broadcast %175 : i32 to vector<16x1xi32>
    %181 = arith.cmpi sle, %16, %180 : vector<16x1xi32>
    %182 = arith.andi %179, %181 : vector<16x1xi1>
    %cst_44 = arith.constant -3.40282347E+38 : f32
    %183 = vector.shape_cast %182 : vector<16x1xi1> to vector<16x1xi1>
    %184 = vector.broadcast %183 : vector<16x1xi1> to vector<16x32xi1>
    %185 = vector.broadcast %cst_44 : f32 to vector<16x32xf32>
    %186 = arith.select %184, %177, %185 : vector<16x32xi1>, vector<16x32xf32>
    %cst_45 = arith.constant dense<0xFF800000> : vector<32xf32>
    %187 = vector.multi_reduction <maximumf>, %186, %cst_45 [0] : vector<16x32xf32> to vector<32xf32>
    %188 = vector.shape_cast %187 : vector<32xf32> to vector<1x32xf32>
    %189 = arith.cmpi sge, %175, %173 : i32
    %cst_46 = arith.constant 0.000000e+00 : f32
    %190 = vector.broadcast %cst_46 : f32 to vector<1x32xf32>
    %191 = arith.select %189, %188, %190 : vector<1x32xf32>
    %c8_i32_47 = arith.constant 8 : i32
    %192 = arith.muli %arg0, %c8_i32_47 : i32
    %c7_i32 = arith.constant 7 : i32
    %193 = arith.addi %192, %c7_i32 : i32
    %194 = arith.index_cast %193 : i32 to index
    %195 = memref.load %arg1[%194] : memref<16xi32, #tpu.memory_space<smem>>
    %196 = tpu.assume_multiple %195, 8 : i32
    %197 = arith.index_cast %193 : i32 to index
    %198 = memref.load %arg2[%197] : memref<16xi32, #tpu.memory_space<smem>>
    %199 = arith.index_cast %193 : i32 to index
    %200 = memref.load %arg3[%199] : memref<16xi32, #tpu.memory_space<smem>>
    %201 = arith.index_cast %196 : i32 to index
    %c0_48 = arith.constant 0 : index
    %202 = vector.load %arg8[%201, %c0_48] : memref<24x32xf32, #tpu.memory_space<vmem>>, vector<16x32xf32>
    %203 = vector.broadcast %198 : i32 to vector<16x1xi32>
    %204 = arith.cmpi sge, %16, %203 : vector<16x1xi32>
    %205 = vector.broadcast %200 : i32 to vector<16x1xi32>
    %206 = arith.cmpi sle, %16, %205 : vector<16x1xi32>
    %207 = arith.andi %204, %206 : vector<16x1xi1>
    %cst_49 = arith.constant -3.40282347E+38 : f32
    %208 = vector.shape_cast %207 : vector<16x1xi1> to vector<16x1xi1>
    %209 = vector.broadcast %208 : vector<16x1xi1> to vector<16x32xi1>
    %210 = vector.broadcast %cst_49 : f32 to vector<16x32xf32>
    %211 = arith.select %209, %202, %210 : vector<16x32xi1>, vector<16x32xf32>
    %cst_50 = arith.constant dense<0xFF800000> : vector<32xf32>
    %212 = vector.multi_reduction <maximumf>, %211, %cst_50 [0] : vector<16x32xf32> to vector<32xf32>
    %213 = vector.shape_cast %212 : vector<32xf32> to vector<1x32xf32>
    %214 = arith.cmpi sge, %200, %198 : i32
    %cst_51 = arith.constant 0.000000e+00 : f32
    %215 = vector.broadcast %cst_51 : f32 to vector<1x32xf32>
    %216 = arith.select %214, %213, %215 : vector<1x32xf32>
    %217 = tpu.concatenate %41, %66, %91, %116, %141, %166, %191, %216 in 0 : vector<1x32xf32>, vector<1x32xf32>, vector<1x32xf32>, vector<1x32xf32>, vector<1x32xf32>, vector<1x32xf32>, vector<1x32xf32>, vector<1x32xf32> -> vector<8x32xf32>
    %218 = arith.truncf %217 : vector<8x32xf32> to vector<8x32xbf16>
    %c0_52 = arith.constant 0 : index
    %c0_53 = arith.constant 0 : index
    %c0_54 = arith.constant 0 : index
    %219 = vector.load %arg6[%c0_52, %c0_53, %c0_54] : memref<1x8x32xbf16, #tpu.memory_space<vmem>>, vector<1x8x32xbf16>
    %220 = vector.shape_cast %219 : vector<1x8x32xbf16> to vector<8x32xbf16>
    %221 = vector.shape_cast %218 : vector<8x32xbf16> to vector<1x8x32xbf16>
    tpu.vector_store %arg6[%c0_52, %c0_53, %c0_54], %221 {strides = array<i32>} : memref<1x8x32xbf16, #tpu.memory_space<vmem>>, vector<1x8x32xbf16>,
    return
  }
  func.func @transform_0(%arg0: i32, %arg1: memref<16xi32, #tpu.memory_space<smem>>, %arg2: memref<16xi32, #tpu.memory_space<smem>>, %arg3: memref<16xi32, #tpu.memory_space<smem>>) -> (i32, i32, i32) {
    %c0_i32 = arith.constant 0 : i32
    %c0_i32_0 = arith.constant 0 : i32
    %c0_i32_1 = arith.constant 0 : i32
    return %arg0, %c0_i32, %c0_i32_0 : i32, i32, i32
  }
  func.func @transform_1(%arg0: i32, %arg1: memref<16xi32, #tpu.memory_space<smem>>, %arg2: memref<16xi32, #tpu.memory_space<smem>>, %arg3: memref<16xi32, #tpu.memory_space<smem>>) -> (i32, i32, i32) {
    %c0_i32 = arith.constant 0 : i32
    %c0_i32_0 = arith.constant 0 : i32
    %c0_i32_1 = arith.constant 0 : i32
    return %arg0, %c0_i32, %c0_i32_0 : i32, i32, i32
  }
  func.func @transform_2(%arg0: i32, %arg1: memref<16xi32, #tpu.memory_space<smem>>, %arg2: memref<16xi32, #tpu.memory_space<smem>>, %arg3: memref<16xi32, #tpu.memory_space<smem>>) -> (i32, i32, i32) {
    %c0_i32 = arith.constant 0 : i32
    %c0_i32_0 = arith.constant 0 : i32
    %c0_i32_1 = arith.constant 0 : i32
    return %arg0, %c0_i32, %c0_i32_0 : i32, i32, i32
  }
  func.func @transform_3(%arg0: i32, %arg1: memref<16xi32, #tpu.memory_space<smem>>, %arg2: memref<16xi32, #tpu.memory_space<smem>>, %arg3: memref<16xi32, #tpu.memory_space<smem>>) -> (i32, i32, i32) {
    %c0_i32 = arith.constant 0 : i32
    %c0_i32_0 = arith.constant 0 : i32
    %c0_i32_1 = arith.constant 0 : i32
    return %arg0, %c0_i32, %c0_i32_0 : i32, i32, i32
  }
}

</mosaic_0001>

<bundles_post_ra>
// kernel: tpu_custom_call.1
= control target key start
LH: loop header
LB: loop body
LE: loop exit
PB: predicated region body
PF: predicated region fallthrough
CT: control target
= control target key end

     0   :  { %s1494_s0 = inlined_call_operand.vmem [shape: s32[16], index: 0, kind: input, shape index: {}]   ;;  %s1495_s3 = inlined_call_operand.vmem [shape: f32[2,16,32], index: 3, kind: input, shape index: {}]   ;;  %s1496_s4 = inlined_call_operand.vmem [shape: f32[2,16,1], index: 4, kind: input, shape index: {}]   ;;  %s1497_s5 = inlined_call_operand.hbm [shape: bf16[2,8,32], index: 5, kind: output, shape index: {0}]   ;;  %s1498_s6 = inlined_call_operand.vmem [shape: f32[2,16,1], index: 6, kind: output, shape index: {1}]   ;;  %s1499_s1 = inlined_call_operand.vmem [shape: s32[16], index: 1, kind: input, shape index: {}]   ;;  %s1500_s2 = inlined_call_operand.vmem [shape: s32[16], index: 2, kind: input, shape index: {}]  }
   0x1   :  { %1524 = sst [smem:[#allocation17_spill]] %s1495_s3  ;;  %s12_s23 = sshll.u32 %s1494_s0, 4  ;;  %s13_s23 = int_to_ptr.vmem [resolvable:$true] %s12_s23 }
   0x2   :  { %1525 = sst [smem:[#allocation18_spill]] %s1496_s4  ;;  %s16_s26 = sshll.u32 %s1499_s1, 4  ;;  %s17_s26 = int_to_ptr.vmem [resolvable:$true] %s16_s26 }
   0x3   :  { %s741_s27 = scalar_lea.vmem %s13_s23, 16  ;;  %p746_p1 = scmp.lt.s32.totalorder %s13_s23, %s13_s23 }
   0x4   :  { %p742_p0 = scmp.ne.s32.totalorder %s13_s23, %s741_s27  ;;  %p747_p2 = scmp.lt.s32.totalorder %s741_s27, %s741_s27 }
   0x6   :  { %p748_p3 = por %p747_p2, %p746_p1 }
   0x8   :  { %p749_p4 = pnand %p748_p3, %p742_p0 }
   0xa   :  { %752 = shalt.err (!%p749_p4)  }
   0xb   :  { %s841_s28 = smov [#allocation4]   ;;  %s753_s29 = scalar_lea.vmem %s17_s26, 16 }
   0xc   :  { %15 = dma.vmem_to_smem %s13_s23, 16, %s841_s28, [#allocation3] }
   0xd   :  { %p754_p5 = scmp.ne.s32.totalorder %s17_s26, %s753_s29  ;;  %p758_p6 = scmp.lt.s32.totalorder %s17_s26, %s17_s26 }
   0xe   :  { %p759_p7 = scmp.lt.s32.totalorder %s753_s29, %s753_s29 }
  0x10   :  { %p760_p8 = por %p759_p7, %p758_p6 }
  0x12   :  { %p761_p9 = pnand %p760_p8, %p754_p5 }
  0x14   :  { %764 = shalt.err (!%p761_p9)  }
  0x15   :  { %s842_s0 = smov [#allocation5]   ;;  %s20_s7 = sshll.u32 %s1500_s2, 4  ;;  %s21_s7 = int_to_ptr.vmem [resolvable:$true] %s20_s7 }
  0x16   :  { %19 = dma.vmem_to_smem %s17_s26, 16, %s842_s0, [#allocation3] }
  0x17   :  { %s765_s8 = scalar_lea.vmem %s21_s7, 16  ;;  %p770_p11 = scmp.lt.s32.totalorder %s21_s7, %s21_s7 }
  0x18   :  { %p766_p10 = scmp.ne.s32.totalorder %s21_s7, %s765_s8  ;;  %p771_p12 = scmp.lt.s32.totalorder %s765_s8, %s765_s8 }
  0x1a   :  { %p772_p13 = por %p771_p12, %p770_p11 }
  0x1c   :  { %p773_p0 = pnand %p772_p13, %p766_p10 }
  0x1e   :  { %776 = shalt.err (!%p773_p0)  }
  0x1f   :  { %s843_s9 = smov [#allocation6]  }
  0x20   :  { %23 = dma.vmem_to_smem %s21_s7, 16, %s843_s9, [#allocation3] }
  0x21   :  { %819 = dma.done.wait [#allocation3], 48 }
  0x22   :  { %820 = vsyncadd [#allocation3], 4294967248 }
  0x23   :  { %25 = sfence }
  0x24   :  { %26 = vsyncpa [#allocation8], 0 }
  0x25   :  { %28 = vsyncpa [#allocation8 + $0x1], 0  ;;  %s891_s10 = smov 0   ;;  %s893_s11 = smov 0  }
  0x26   :  { %s895_s2 = smov 0   ;;  %s897_s12 = smov 0  }
  0x27 LB: > { %1526 = sst [smem:[#allocation11_spill]] %s827_s10  ;;  %s912_s13 = sadd.s32 4294967295, %s839_s12   ;;  %s839_s12 = sphi %s897_s12, %s1660_s12   ;;  %s835_s2 = sphi %s895_s2, %s1662_s2   ;;  %s831_s11 = sphi %s893_s11, %s1664_s11   ;;  %s827_s10 = sphi %s891_s10, %s1663_s10  }
  0x28   : > { %1527 = sst [smem:[#allocation12_spill]] %s835_s2  ;;  %s677_s14 = sadd.s32 4294967294, %s839_s12  }
  0x29   : > { %1528 = sst [smem:[#allocation13_spill]] %s839_s12  ;;  %s916_s15 = sadd.s32 1, %s839_s12  }
  0x2a   : > { %1529 = sst [smem:[#allocation14_spill]] %s916_s15  ;;  %s93_s16 = sadd.s32 1, %s835_s2 }
  0x2b   : > { %s90_s17 = ssub.s32 %s839_s12, %s916_s15  ;;  %p103_p1 = scmp.ne.s32.totalorder %s835_s2, %s831_s11 }
  0x2c   : > { %p91_p2 = scmp.eq.s32.totalorder %s90_s17, 0  ;;  %p104_p3 = scmp.eq.s32.totalorder %s912_s13, 1 }
  0x2d   : > { %p109_p4 = scmp.ne.s32.totalorder %s831_s11, %s827_s10  ;;  %p110_p5 = scmp.eq.s32.totalorder %s677_s14, 1 }
  0x2e   : > { %s927_s18 = scalar_select %p91_p2, %s835_s2, %s93_s16  }
  0x2f   : > { %p929_p6 = por %p104_p3, %p103_p1  ;;  %p933_p7 = por %p110_p5, %p109_p4 }
  0x30   : > { %1530 = sst [smem:[#allocation15_spill]] %s927_s18  ;;  %p680_p8 = scmp.ge.s32.totalorder %s839_s12, 1 }
  0x31   : > { %s1532_s20 = scalar_select %p933_p7, 1, 0 }
  0x32   : > { %p170_p9 = scmp.lt.s32.totalorder %s839_s12, 3 }
  0x33   : > { %1533 = sst [smem:[#allocation16_spill]] %s1532_s20 }
  0x34   : > { %p171_p10 = pnand %p680_p8, %p170_p9 }
  0x35   : > { %p204_p11 = scmp.lt.s32.totalorder (!%p171_p10), %s912_s13, 1  ;;  %s1534_s4 = sld [smem:[#allocation18_spill]] (!%p171_p10) }
  0x36   : > { %174 = sbr.rel (%p171_p10) target bundleno = 336 (0x150), region = 28  ;;  %s949_s26 = sshll.u32 (!%p171_p10), %s912_s13, 3 }
  0x37   : > { %s289_s27 = sadd.s32 (!%p171_p10), 1, %s949_s26  ;;  %s953_s28 = sld [smem:[#allocation4 + %s949_s26]] (!%p171_p10) }
  0x38   : > { %s955_s29 = sld [smem:[#allocation4 + %s289_s27]] (!%p171_p10)  ;;  %s324_s30 = sadd.s32 (!%p171_p10), 2, %s949_s26 }
  0x39   : > { %s958_s0 = sld [smem:[#allocation5 + %s949_s26]] (!%p171_p10)  ;;  %s359_s14 = sadd.s32 (!%p171_p10), 3, %s949_s26 }
  0x3a   : > { %s961_s1 = sld [smem:[#allocation6 + %s949_s26]] (!%p171_p10)  ;;  %s394_s23 = sadd.s32 (!%p171_p10), 4, %s949_s26 }
  0x3b   : > { %v844_v0 = vmov 0   ;;  %s205_s21 = scalar_select %p204_p11, %s912_s13, 1  ;;  %vm1507_vm0 = vcmask 261120   ;;  %v845_v2 = vmov 0.0   ;;  %v251_v4 = vlaneseq }
  0x3c   : > { %740 = vset.pattern.permute.xlu0 %v844_v0  ;;  %250 = vst.msk [vmem:[#allocation2 + $0x10] sm:$0xff] %vm1507_vm0, %v845_v2  ;;  %s964_s7 = sld [smem:[#allocation5 + %s289_s27]]  ;;  %s429_s15 = sadd.s32 5, %s949_s26  ;;  %v1542_v20 = vmov 0  ;;  %v1556_v34 = vmov 0  ;;  %v1558_v35 = vmov 0 }
  0x3d   : > { %s941_s22 = sshll.u32 %s205_s21, 4  ;;  %s966_s8 = sld [smem:[#allocation6 + %s289_s27]]  ;;  %v989_v5 = vshrl.u32 %v251_v4, 7  ;;  %v1560_v38 = vmov 0  ;;  %v1562_v39 = vmov 0  ;;  %v1566_v42 = vmov 0 }
  0x3e   : > { %s213_s25 = scalar_lea.vmem %s1534_s4, %s941_s22  ;;  %s968_s9 = sld [smem:[#allocation4 + %s324_s30]]  ;;  %v1568_v43 = vmov 0  ;;  %v1570_v44 = vmov 0  ;;  %v1572_v46 = vmov 0  ;;  %v1574_v47 = vmov 0 }
  0x3f   : > { %v221_v1 = vld [vmem:[%s213_s25] sm:$0xff]  ;;  %v222_v3 = vld [vmem:[%s213_s25 + $0x8] sm:$0xff]  ;;  %s971_s16 = sld [smem:[#allocation5 + %s324_s30]]  ;;  %s998_s12 = sadd.s32 6, %s949_s26  ;;  %v1005_v8 = vadd.s32 8, %v989_v5  ;;  %v261_v9 = vstv %s958_s0  ;;  %v1576_v48 = vmov 0 }
  0x40   : > { %225 = vperm.xlu0 %740, %v221_v1   ;;  %s973_s17 = sld [smem:[#allocation6 + %s324_s30]]  ;;  %p284_p12 = scmp.ge.s32.totalorder %s961_s1, %s958_s0  ;;  %v264_v11 = vstv %s961_s1  ;;  %vm1024_vm1 = vcmp.ge.s32.totalorder %v989_v5, %v261_v9  ;;  %v1578_v51 = vmov 0  ;;  %v1580_v52 = vmov 0 }
  0x41   : > { %s975_s21 = sld [smem:[#allocation4 + %s359_s14]]  ;;  %s1015_s27 = sadd.s32 7, %s949_s26  ;;  %vm1035_vm2 = vcmp.ge.s32.totalorder %v1005_v8, %v261_v9  ;;  %vm1040_vm3 = vcmp.le.s32.totalorder %v989_v5, %v264_v11  ;;  %vm1045_vm4 = vcmp.le.s32.totalorder %v1005_v8, %v264_v11  ;;  %v1582_v53 = vmov 0 }
  0x42   : > { %s978_s24 = sld [smem:[#allocation5 + %s359_s14]]  ;;  %v296_v13 = vstv %s964_s7  ;;  %v1543_v20 = vsel %vm1045_vm4, 4294967295, %v1542_v20  ;;  %v1584_v55 = vmov 0  ;;  %v1586_v62 = vmov 0 }
  0x43   : > { %s1535_s3 = sld [smem:[#allocation17_spill]]  ;;  %v299_v16 = vstv %s966_s8  ;;  %p319_p13 = scmp.ge.s32.totalorder %s966_s8, %s964_s7  ;;  %vm1056_vm5 = vcmp.ge.s32.totalorder %v989_v5, %v296_v13  ;;  %vm1061_vm6 = vcmp.ge.s32.totalorder %v1005_v8, %v296_v13  ;;  %v1588_v63 = vmov 0 }
  0x44   : > { %230 = vperm.xlu0 %740, %v222_v3   ;;  %s984_s18 = sld [smem:[#allocation6 + %s359_s14]]  ;;  %vm1072_vm7 = vcmp.le.s32.totalorder %v989_v5, %v299_v16  ;;  %vm1077_vm8 = vcmp.le.s32.totalorder %v1005_v8, %v299_v16  ;;  %s293_s8 = scalar_lea.vmem [#allocation2], %s955_s29  ;;  %v1590_v0 = vmov 0  ;;  %v1602_v13 = vmov 0 }
  0x45   : > { %s986_s2 = sld [smem:[#allocation4 + %s394_s23]]  ;;  %v331_v21 = vstv %s971_s16  ;;  %s328_s29 = scalar_lea.vmem [#allocation2], %s968_s9 }
  0x46   : > { %s991_s30 = sld [smem:[#allocation5 + %s394_s23]]  ;;  %v334_v25 = vstv %s973_s17  ;;  %p354_p0 = scmp.ge.s32.totalorder %s973_s17, %s971_s16  ;;  %vm1091_vm9 = vcmp.ge.s32.totalorder %v989_v5, %v331_v21  ;;  %vm1096_vm10 = vcmp.ge.s32.totalorder %v1005_v8, %v331_v21 }
  0x47   : > { %s993_s20 = sld [smem:[#allocation6 + %s394_s23]]  ;;  %vm1113_vm12 = vcmp.le.s32.totalorder %v989_v5, %v334_v25  ;;  %vm1118_vm13 = vcmp.le.s32.totalorder %v1005_v8, %v334_v25  ;;  %s363_s9 = scalar_lea.vmem [#allocation2], %s975_s21 }
  0x48   : > { %s995_s10 = sld [smem:[#allocation4 + %s429_s15]]  ;;  %v366_v28 = vstv %s978_s24  ;;  %v1557_v34 = vsel %vm1113_vm12, 4294967295, %v1556_v34  ;;  %v1559_v35 = vsel %vm1118_vm13, 4294967295, %v1558_v35  ;;  %vm1596_vm13 = vcmask 261120  }
  0x49   : > { %s208_s4 = scalar_lea.vmem %s1535_s3, %s941_s22  ;;  %s1002_s14 = sld [smem:[#allocation5 + %s429_s15]]  ;;  %vm1134_vm15 = vcmp.ge.s32.totalorder %v989_v5, %v366_v28 }
  0x4a   : > { %v219_v6 = vld [vmem:[%s208_s4] sm:$0xff]  ;;  %s1008_s23 = sld [smem:[#allocation6 + %s429_s15]]  ;;  %v220_v12 = vld [vmem:[%s208_s4 + $0x8] sm:$0xff]  ;;  %v369_v29 = vstv %s984_s18  ;;  %p389_p1 = scmp.ge.s32.totalorder %s984_s18, %s978_s24  ;;  %v1561_v38 = vsel %vm1134_vm15, 4294967295, %v1560_v38 }
  0x4b   : > { %s1012_s25 = sld [smem:[#allocation5 + %s998_s12]]  ;;  %vm1144_vm11 = vcmp.le.s32.totalorder %v989_v5, %v369_v29  ;;  %vm1154_vm4 = vcmp.le.s32.totalorder %v1005_v8, %v369_v29  ;;  %s398_s16 = scalar_lea.vmem [#allocation2], %s986_s2 }
  0x4c   : > { %s1019_s3 = sld [smem:[#allocation6 + %s998_s12]]  ;;  %v401_v33 = vstv %s991_s30  ;;  %v1567_v42 = vsel %vm1154_vm4, 4294967295, %v1566_v42 }
  0x4d   : > { %s1031_s15 = scalar_select %p284_p12, 1, 0  ;;  %v404_v36 = vstv %s993_s20  ;;  %vm1169_vm15 = vcmp.ge.s32.totalorder %v1005_v8, %v401_v33 }
  0x4e   : > { %s1053_s4 = sld [smem:[#allocation5 + %s1015_s27]]  ;;  %p424_p2 = scmp.ge.s32.totalorder %s993_s20, %s991_s30  ;;  %v1571_v44 = vsel %vm1169_vm15, 4294967295, %v1570_v44  ;;  %vm1179_vm4 = vcmp.le.s32.totalorder %v989_v5, %v404_v36 }
  0x4f   : > { %s1069_s26 = sld [smem:[#allocation6 + %s1015_s27]]  ;;  %v436_v37 = vstv %s1002_s14  ;;  %v1573_v46 = vsel %vm1179_vm4, 4294967295, %v1572_v46  ;;  %v286_v50 = vstv %s1031_s15  ;;  %s258_s20 = scalar_lea.vmem [#allocation2], %s953_s28 }
  0x50   : > { %s1086_s0 = sld [smem:[#allocation4 + %s998_s12]]  ;;  %v439_v41 = vstv %s1008_s23  ;;  %vm1194_vm15 = vcmp.ge.s32.totalorder %v989_v5, %v436_v37  ;;  %vm1205_vm4 = vcmp.ge.s32.totalorder %v1005_v8, %v436_v37  ;;  %s433_s2 = scalar_lea.vmem [#allocation2], %s995_s10 }
  0x51   : > { %s1110_s12 = scalar_select %p319_p13, 1, 0  ;;  %v471_v45 = vstv %s1012_s25  ;;  %v1577_v48 = vsel %vm1194_vm15, 4294967295, %v1576_v48  ;;  %v1579_v51 = vsel %vm1205_vm4, 4294967295, %v1578_v51  ;;  %vm1215_vm15 = vcmp.le.s32.totalorder %v1005_v8, %v439_v41 }
  0x52   : > { %s1131_s1 = scalar_select %p354_p0, 1, 0  ;;  %v474_v49 = vstv %s1019_s3  ;;  %v1583_v53 = vsel %vm1215_vm15, 4294967295, %v1582_v53  ;;  %vm1225_vm12 = vcmp.ge.s32.totalorder %v989_v5, %v471_v45  ;;  %vm1235_vm4 = vcmp.ge.s32.totalorder %v1005_v8, %v471_v45  ;;  %vm1592_vm15 = vmand %vm1024_vm1, %vm1040_vm3 }
  0x53   : > { %s1161_s7 = scalar_select %p389_p1, 1, 0  ;;  %v321_v54 = vstv %s1110_s12  ;;  %v1585_v55 = vsel %vm1225_vm12, 4294967295, %v1584_v55  ;;  %v1587_v62 = vsel %vm1235_vm4, 4294967295, %v1586_v62  ;;  %vm1240_vm14 = vcmp.le.s32.totalorder %v989_v5, %v474_v49  ;;  %vm1597_vm1 = vmmov %vm1596_vm13 }
  0x54   : > { %s1191_s18 = scalar_select %p424_p2, 1, 0  ;;  %v506_v56 = vstv %s1053_s4  ;;  %v356_v61 = vstv %s1131_s1  ;;  %v1589_v63 = vsel %vm1240_vm14, 4294967295, %v1588_v63  ;;  %vm1245_vm12 = vcmp.le.s32.totalorder %v1005_v8, %v474_v49 }
  0x55   : > { %v509_v57 = vstv %s1069_s26  ;;  %v1591_v0 = vsel %vm1245_vm12, 4294967295, %v1590_v0  ;;  %s1250_s28 = sld [smem:[#allocation4 + %s1015_s27]]  ;;  %vm1593_vm4 = vnez %v1543_v20  ;;  %vm1595_vm12 = vnez %v1561_v38  ;;  %p459_p3 = scmp.ge.s32.totalorder %s1008_s23, %s1002_s14 }
  0x56   : > { %vm1600_vm3 = vnez %v1567_v42  ;;  %vm1614_vm14 = vcmask 261120   ;;  %s468_s10 = scalar_lea.vmem [#allocation2], %s1086_s0  ;;  %p494_p4 = scmp.ge.s32.totalorder %s1019_s3, %s1012_s25 }
  0x57   : > { %s460_s21 = scalar_select %p459_p3, 1, 0 }
  0x58   : > { %p529_p5 = scmp.ge.s32.totalorder %s1069_s26, %s1053_s4  ;;  %s194_s30 = sand.u32 1, %s831_s11  }
  0x59   : > { %s495_s24 = scalar_select %p494_p4, 1, 0 }
  0x5a   : > { %s530_s3 = scalar_select %p529_p5, 1, 0 }
  0x5b   : > { %s503_s17 = scalar_lea.vmem [#allocation2], %s1250_s28  ;;  %s681_s14 = sshll.u32 %s194_s30, 2 }
  0x5c   : > { %s690_s23 = sshll.u32 %s912_s13, 6  ;;  %s196_s25 = scalar_lea.vmem [#allocation7], %s681_s14 }
  0x5d   : > { %s570_s27 = sshll.u32 %s196_s25, 4  ;;  %s568_s26 = scalar_lea.hbm %s1497_s5, %s690_s23  ;;  %s571_s27 = int_to_ptr.vmem [resolvable:$true] %s570_s27 }
  0x5e   : > { %s552_s0 = scalar_lea.sflag [#allocation8], %s194_s30  ;;  %s777_s12 = scalar_lea.vmem %s571_s27, 64 }
  0x5f   : > { %p778_p8 = scmp.ne.s32.totalorder %s571_s27, %s777_s12  ;;  %s846_s1 = smov [#allocation7]  }
  0x60   : > { %s781_s13 = sshll.u32 %s846_s1, 4  ;;  %s782_s13 = int_to_ptr.vmem [resolvable:$false] %s781_s13 }
  0x61   : > { %p779_p9 = pnand %p778_p8, %p929_p6  ;;  %p784_p11 = scmp.lt.s32.totalorder %s571_s27, %s782_s13 }
  0x63   : > { %p780_p10 = pneg %p779_p9 }
  0xbb   : > { %v226_v7 = vpop.permute.xlu0 %225 }
  0xbc   : > { %v233_v10 = vmul.f32 %v226_v7, %v219_v6  ;;  %v391_v6 = vstv %s1161_s7  ;;  %v426_v7 = vstv %s1191_s18  ;;  %s783_s7 = scalar_lea.vmem %s782_s13, 128 }
  0xbd   : > { %p785_p12 = scmp.lt.s32.totalorder %s783_s7, %s777_s12 }
  0xbe   : > { %248 = vst.msk [vmem:[#allocation2] sm:$0xff] %vm1507_vm0, %v233_v10  ;;  %v236_v14 = vsel %vm1507_vm0, %v233_v10, 0.0 }
  0xbf   : > { %v231_v17 = vpop.permute.xlu0 %230  ;;  %237 = vadd.xlane.f32.xlu1 %v236_v14  ;;  %p786_p13 = por %p785_p12, %p784_p11 }
  0xc0   : > { %v234_v22 = vmul.f32 %v231_v17, %v220_v12 }
  0xc1   : > { %p787_p0 = pnand %p786_p13, %p780_p10 }
  0xc2   : > { %249 = vst.msk [vmem:[#allocation2 + $0x8] sm:$0xff] %vm1507_vm0, %v234_v22  ;;  %v239_v30 = vsel %vm1507_vm0, %v234_v22, 0.0  ;;  %vm1139_vm0 = vcmp.ge.s32.totalorder %v1005_v8, %v366_v28 }
  0xc3   : > { %240 = vadd.xlane.f32.xlu1 %v239_v30  ;;  %v1563_v39 = vsel %vm1139_vm0, 4294967295, %v1562_v39  ;;  %vm1164_vm0 = vcmp.ge.s32.totalorder %v989_v5, %v401_v33 }
  0xc4   : > { %v1569_v43 = vsel %vm1164_vm0, 4294967295, %v1568_v43  ;;  %vm1184_vm0 = vcmp.le.s32.totalorder %v1005_v8, %v404_v36 }
  0xc5   : > { %v1575_v47 = vsel %vm1184_vm0, 4294967295, %v1574_v47  ;;  %vm1210_vm0 = vcmp.le.s32.totalorder %v989_v5, %v439_v41 }
  0xc6   : > { %v1581_v52 = vsel %vm1210_vm0, 4294967295, %v1580_v52  ;;  %vm1594_vm0 = vmand %vm1035_vm2, %vm1593_vm4  ;;  %vm1601_vm4 = vnez %v1563_v39  ;;  %v1632_v39 = vmov 0 }
  0xc7   : > { %vm1598_vm2 = vmand %vm1056_vm5, %vm1072_vm7  ;;  %vm1606_vm5 = vcmask 261120   ;;  %vm1608_vm7 = vnez %v1557_v34 }
  0xc9   : > { %v259_v58 = vld [vmem:[%s258_s20] sm:$0xff]  ;;  %v260_v59 = vld [vmem:[%s258_s20 + $0x8] sm:$0xff] }
  0xca   : > { %v294_v60 = vld [vmem:[%s293_s8] sm:$0xff]  ;;  %v295_v1 = vld [vmem:[%s293_s8 + $0x8] sm:$0xff]  ;;  %v273_v2 = vsel %vm1592_vm15, %v259_v58, -3.4028235e+38  ;;  %v274_v3 = vsel %vm1594_vm0, %v260_v59, -3.4028235e+38  ;;  %vm1599_vm0 = vmand %vm1061_vm6, %vm1077_vm8 }
  0xcb   : > { %v329_v4 = vld [vmem:[%s328_s29] sm:$0xff]  ;;  %v275_v9 = vsel %vm1596_vm13, %v273_v2, -inf  ;;  %v276_v10 = vsel %vm1597_vm1, %v274_v3, -inf  ;;  %v308_v11 = vsel %vm1598_vm2, %v294_v60, -3.4028235e+38  ;;  %vm1286_vm13 = vcmp.ge.s32.totalorder %v989_v5, %v506_v56  ;;  %vm1607_vm6 = vmmov %vm1606_vm5  ;;  %v330_v18 = vld [vmem:[%s328_s29 + $0x8] sm:$0xff] }
  0xcc   : > { %v309_v12 = vsel %vm1599_vm0, %v295_v1, -3.4028235e+38  ;;  %v1603_v13 = vsel %vm1286_vm13, 4294967295, %v1602_v13  ;;  %vm1291_vm1 = vcmp.le.s32.totalorder %v989_v5, %v509_v57  ;;  %v277_v15 = vmax.f32 %v275_v9, %v276_v10  ;;  %vm1609_vm8 = vmand %vm1091_vm9, %vm1608_vm7  ;;  %v364_v20 = vld [vmem:[%s363_s9] sm:$0xff]  ;;  %v365_v23 = vld [vmem:[%s363_s9 + $0x8] sm:$0xff] }
  0xcd   : > { %v310_v16 = vsel %vm1606_vm5, %v308_v11, -inf  ;;  %v311_v17 = vsel %vm1607_vm6, %v309_v12, -inf  ;;  %v343_v19 = vsel %vm1609_vm8, %v329_v4, -3.4028235e+38  ;;  %vm1610_vm2 = vnez %v1573_v46  ;;  %vm1615_vm9 = vmand %vm1595_vm12, %vm1144_vm11  ;;  %v399_v31 = vld [vmem:[%s398_s16] sm:$0xff] }
  0xce   : > { %vm1611_vm0 = vnez %v1569_v43  ;;  %v312_v5 = vmax.f32 %v310_v16, %v311_v17  ;;  %vm1612_vm5 = vnez %v1559_v35  ;;  %v345_v22 = vsel %vm1614_vm14, %v343_v19, -inf  ;;  %vm1622_vm11 = vmand %vm1601_vm4, %vm1600_vm3  ;;  %v400_v35 = vld [vmem:[%s398_s16 + $0x8] sm:$0xff]  ;;  %v434_v37 = vld [vmem:[%s433_s2] sm:$0xff] }
  0xcf   : > { %vm1613_vm6 = vmand %vm1096_vm10, %vm1612_vm5  ;;  %v378_v24 = vsel %vm1615_vm9, %v364_v20, -3.4028235e+38  ;;  %vm1616_vm7 = vnez %v1575_v47  ;;  %vm1617_vm8 = vnez %v1571_v44  ;;  %vm1323_vm13 = vcmp.ge.s32.totalorder %v1005_v8, %v506_v56  ;;  %v435_v43 = vld [vmem:[%s433_s2 + $0x8] sm:$0xff]  ;;  %v504_v16 = vld [vmem:[%s503_s17] sm:$0xff] }
  0xd0   : > { %v344_v21 = vsel %vm1613_vm6, %v330_v18, -3.4028235e+38  ;;  %vm1328_vm10 = vcmp.le.s32.totalorder %v1005_v8, %v509_v57  ;;  %v278_v27 = vrot.slane %v277_v15, 4  ;;  %v379_v29 = vsel %vm1622_vm11, %v365_v23, -3.4028235e+38  ;;  %vm1623_vm12 = vmmov %vm1614_vm14  ;;  %v470_v57 = vld [vmem:[%s468_s10 + $0x8] sm:$0xff] }
  0xd1   : > { %v346_v28 = vsel %vm1614_vm14, %v344_v21, -inf  ;;  %v380_v30 = vsel %vm1623_vm12, %v378_v24, -inf  ;;  %vm1624_vm5 = vnez %v1581_v52  ;;  %vm1625_vm6 = vnez %v1577_v48  ;;  %vm1628_vm14 = vmmov %vm1623_vm12  ;;  %v469_v52 = vld [vmem:[%s468_s10] sm:$0xff]  ;;  %v505_v21 = vld [vmem:[%s503_s17 + $0x8] sm:$0xff] }
  0xd2   : > { %vm1344_vm15 = vcmp.eq.s32.totalorder %v286_v50, 1  ;;  %v1626_v8 = vmov 0  ;;  %v313_v32 = vrot.slane %v312_v5, 4  ;;  %v347_v33 = vmax.f32 %v345_v22, %v346_v28  ;;  %vm1629_vm3 = vmand %vm1611_vm0, %vm1610_vm2 }
  0xd3   : > { %v1627_v8 = vsel %vm1344_vm15, 4294967295, %v1626_v8  ;;  %v381_v34 = vsel %vm1628_vm14, %v379_v29, -inf  ;;  %v413_v36 = vsel %vm1629_vm3, %v399_v31, -3.4028235e+38  ;;  %vm1630_vm4 = vnez %v1583_v53  ;;  %vm1634_vm2 = vmand %vm1617_vm8, %vm1616_vm7 }
  0xd4   : > { %vm1631_vm11 = vnez %v1579_v51  ;;  %v279_v38 = vmax.f32 %v277_v15, %v278_v27  ;;  %vm1361_vm9 = vcmp.eq.s32.totalorder %v321_v54, 1  ;;  %v382_v40 = vmax.f32 %v380_v30, %v381_v34  ;;  %vm1635_vm0 = vmmov %vm1623_vm12 }
  0xd5   : > { %v1633_v39 = vsel %vm1361_vm9, 4294967295, %v1632_v39  ;;  %v414_v41 = vsel %vm1634_vm2, %v400_v35, -3.4028235e+38  ;;  %v415_v42 = vsel %vm1635_vm0, %v413_v36, -inf  ;;  %v314_v45 = vmax.f32 %v312_v5, %v313_v32  ;;  %vm1636_vm14 = vmmov %vm1635_vm0 }
  0xd6   : > { %v348_v46 = vrot.slane %v347_v33, 4  ;;  %v416_v49 = vsel %vm1636_vm14, %v414_v41, -inf  ;;  %vm1637_vm3 = vmand %vm1625_vm6, %vm1624_vm5  ;;  %vm1638_vm12 = vnez %v1589_v63  ;;  %vm1639_vm9 = vnez %v1585_v55 }
  0xd7   : > { %v448_v50 = vsel %vm1637_vm3, %v434_v37, -3.4028235e+38  ;;  %vm477_vm15 = vmand %vm1639_vm9, %vm1638_vm12  ;;  %v280_v44 = vrot.slane %v279_v38, 2  ;;  %vm1383_vm7 = vcmp.eq.s32.totalorder %v356_v61, 1  ;;  %v383_v54 = vrot.slane %v382_v40, 4 }
  0xd8   : > { %v417_v56 = vmax.f32 %v415_v42, %v416_v49  ;;  %vm1642_vm8 = vmand %vm1631_vm11, %vm1630_vm4  ;;  %vm1643_vm5 = vnez %v1591_v0  ;;  %vm1644_vm6 = vnez %v1587_v62  ;;  %vm534_vm0 = vcmask 1040384  }
  0xd9   : > { %v449_v48 = vsel %vm1642_vm8, %v435_v43, -3.4028235e+38  ;;  %vm478_vm2 = vmand %vm1644_vm6, %vm1643_vm5  ;;  %v315_v58 = vrot.slane %v314_v45, 2  ;;  %v349_v59 = vmax.f32 %v347_v33, %v348_v46  ;;  %v450_v60 = vsel %vm1636_vm14, %v448_v50, -inf }
  0xda   : > { %vm1645_vm3 = vmmov %vm1636_vm14  ;;  %v281_v53 = vmax.f32 %v279_v38, %v280_v44  ;;  %v384_v61 = vmax.f32 %v382_v40, %v383_v54  ;;  %v418_v1 = vrot.slane %v417_v56, 4  ;;  %vm536_vm4 = vcmask 1041408  }
  0xdb   : > { %v451_v51 = vsel %vm1645_vm3, %v449_v48, -inf  ;;  %v316_v3 = vmax.f32 %v314_v45, %v315_v58  ;;  %v350_v4 = vrot.slane %v349_v59, 2  ;;  %vm1401_vm11 = vcmp.eq.s32.totalorder %v391_v6, 1  ;;  %vm1649_vm6 = vmmov %vm1645_vm3 }
  0xdc   : > { %v452_v2 = vmax.f32 %v450_v60, %v451_v51  ;;  %v483_v62 = vsel %vm477_vm15, %v469_v52, -3.4028235e+38  ;;  %v484_v9 = vsel %vm478_vm2, %v470_v57, -3.4028235e+38  ;;  %v282_v10 = vrot.slane %v281_v53, 1  ;;  %vm1650_vm9 = vmmov %vm1645_vm3 }
  0xdd   : > { %v385_v11 = vrot.slane %v384_v61, 2  ;;  %v419_v12 = vmax.f32 %v417_v56, %v418_v1  ;;  %vm1648_vm8 = vnez %v1603_v13  ;;  %v317_v6 = vrot.slane %v316_v3, 1  ;;  %vm513_vm15 = vmand %vm1323_vm13, %vm1328_vm10 }
  0xde   : > { %v453_v15 = vrot.slane %v452_v2, 4  ;;  %vm512_vm5 = vmand %vm1648_vm8, %vm1291_vm1  ;;  %v351_v55 = vmax.f32 %v349_v59, %v350_v4  ;;  %v485_v63 = vsel %vm1649_vm6, %v483_v62, -inf  ;;  %v486_v17 = vsel %vm1650_vm9, %v484_v9, -inf }
  0xdf   : > { %v283_v18 = vmax.f32 %v281_v53, %v282_v10  ;;  %v386_v19 = vmax.f32 %v384_v61, %v385_v11  ;;  %v420_v20 = vrot.slane %v419_v12, 2  ;;  %v318_v13 = vmax.f32 %v316_v3, %v317_v6  ;;  %vm1653_vm13 = vmmov %vm1645_vm3 }
  0xe0   : > { %v454_v5 = vmax.f32 %v452_v2, %v453_v15  ;;  %v352_v14 = vrot.slane %v351_v55, 1  ;;  %v487_v22 = vmax.f32 %v485_v63, %v486_v17  ;;  %v518_v23 = vsel %vm512_vm5, %v504_v16, -3.4028235e+38  ;;  %vm1654_vm10 = vmmov %vm1645_vm3 }
  0xe1   : > { %vm1651_vm1 = vnez %v1627_v8  ;;  %v387_v27 = vrot.slane %v386_v19, 1  ;;  %v421_v28 = vmax.f32 %v419_v12, %v420_v20  ;;  %vm1652_vm12 = vnez %v1633_v39 }
  0xe2   : > { %v288_v24 = vsel %vm1651_vm1, %v283_v18, 0.0  ;;  %v455_v29 = vrot.slane %v454_v5, 2  ;;  %v323_v30 = vsel %vm1652_vm12, %v318_v13, 0.0  ;;  %v353_v26 = vmax.f32 %v351_v55, %v352_v14 }
  0xe3   : > { %v488_v25 = vrot.slane %v487_v22, 4  ;;  %v519_v31 = vsel %vm513_vm15, %v505_v21, -3.4028235e+38  ;;  %v388_v32 = vmax.f32 %v386_v19, %v387_v27  ;;  %v422_v33 = vrot.slane %v421_v28, 1 }
  0xe4   : > { %v456_v34 = vmax.f32 %v454_v5, %v455_v29  ;;  %v520_v8 = vsel %vm1653_vm13, %v518_v23, -inf  ;;  %v358_v35 = vsel %vm1383_vm7, %v353_v26, 0.0  ;;  %v521_v37 = vsel %vm1654_vm10, %v519_v31, -inf }
  0xe5   : > { %v489_v36 = vmax.f32 %v487_v22, %v488_v25  ;;  %v535_v38 = vsel %vm534_vm0, %v288_v24, %v323_v30  ;;  %v522_v40 = vmax.f32 %v520_v8, %v521_v37  ;;  %vm538_vm2 = vcmask 1042432  }
  0xe6   : > { %v457_v39 = vrot.slane %v456_v34, 1  ;;  %v423_v41 = vmax.f32 %v421_v28, %v422_v33  ;;  %v537_v43 = vsel %vm536_vm4, %v535_v38, %v358_v35  ;;  %v393_v45 = vsel %vm1401_vm11, %v388_v32, 0.0 }
  0xe7   : > { %v490_v42 = vrot.slane %v489_v36, 2  ;;  %vm1447_vm7 = vcmp.eq.s32.totalorder %v426_v7, 1  ;;  %v461_v49 = vstv %s460_s21  ;;  %v523_v50 = vrot.slane %v522_v40, 4 }
  0xe8   : > { %v539_v47 = vsel %vm538_vm2, %v537_v43, %v393_v45  ;;  %vm540_vm0 = vcmask 1043456   ;;  %v458_v54 = vmax.f32 %v456_v34, %v457_v39  ;;  %v428_v48 = vsel %vm1447_vm7, %v423_v41, 0.0 }
  0xe9   : > { %v491_v44 = vmax.f32 %v489_v36, %v490_v42  ;;  %v524_v56 = vmax.f32 %v522_v40, %v523_v50  ;;  %vm462_vm14 = vcmp.eq.s32.totalorder %v461_v49, 1  ;;  %v496_v57 = vstv %s495_s24 }
  0xea   : > { %v541_v58 = vsel %vm540_vm0, %v539_v47, %v428_v48  ;;  %vm542_vm3 = vcmask 1044480   ;;  %v463_v60 = vsel %vm462_vm14, %v458_v54, 0.0  ;;  %vm497_vm4 = vcmp.eq.s32.totalorder %v496_v57, 1 }
  0xeb   : > { %v492_v52 = vrot.slane %v491_v44, 1  ;;  %v525_v7 = vrot.slane %v524_v56, 2  ;;  %v531_v53 = vstv %s530_s3  ;;  %v543_v61 = vsel %vm542_vm3, %v541_v58, %v463_v60 }
  0xec   : > { %vm544_vm11 = vcmask 1045504   ;;  %vm532_vm8 = vcmp.eq.s32.totalorder %v531_v53, 1  ;;  %vm546_vm5 = vcmask 1046528   ;;  %vm549_vm6 = vcmask 257024  }
  0xed   : > { %v493_v59 = vmax.f32 %v491_v44, %v492_v52  ;;  %v526_v51 = vmax.f32 %v524_v56, %v525_v7 }
  0xef   : > { %v527_v1 = vrot.slane %v526_v51, 1  ;;  %v498_v2 = vsel %vm497_vm4, %v493_v59, 0.0 }
  0xf0   : > { %v545_v4 = vsel %vm544_vm11, %v543_v61, %v498_v2 }
  0xf1   : > { %v528_v3 = vmax.f32 %v526_v51, %v527_v1 }
  0xf3   : > { %v533_v0 = vsel %vm532_vm8, %v528_v3, 0.0 }
  0xf4   : > { %v547_v62 = vsel %vm546_vm5, %v545_v4, %v533_v0 }
  0xf5   : > { %v548_v9 = vpack.c.bf16 %v547_v62, %v547_v62 }
  0xf7   : > { %550 = vst.msk [vmem:[%s196_s25] sm:$0xf] %vm549_vm6, %v548_v9 }
  0xf8   : > { %790 = shalt.err (!%p787_p0)
}
  0xf9   : > { %s791_s18 = scalar_lea.hbm %s568_s26, 64  ;;  %s795_s28 = scalar_lea.hbm %s1497_s5, 128 }
  0xfa   : > { %p792_p1 = scmp.ne.s32.totalorder %s568_s26, %s791_s18  ;;  %p796_p4 = scmp.lt.s32.totalorder %s568_s26, %s1497_s5 }
  0xfb   : > { %p797_p5 = scmp.lt.s32.totalorder %s795_s28, %s791_s18 }
  0xfc   : > { %p793_p2 = pnand %p792_p1, %p929_p6 }
  0xfd   : > { %p798_p8 = por %p797_p5, %p796_p4 }
  0xfe   : > { %p794_p3 = pneg %p793_p2 }
 0x100   : > { %p799_p9 = pnand %p798_p8, %p794_p3 }
 0x102   : > { %802 = shalt.err (!%p799_p9)
}
 0x103   : > { %696 = dma.vmem_to_hbm [thread:$0]  (%p929_p6), %s571_s27, 64, %s568_s26, %s552_s0   ;;  %vm245_vm9 = vcmask 7168  }
 0x104   : > { %s218_s10 = scalar_lea.vmem %s1498_s6, %s941_s22 }
 0x148   : > { %v238_v10 = vpop.xlane.xlu1 %237 }
 0x149   : > { %v243_v11 = vmul.f32 0.03125, %v238_v10 }
 0x14b   : > { %246 = vst.msk [vmem:[%s218_s10] sm:$0xff] %vm245_vm9, %v243_v11 }
 0x14c   : > { %v241_v12 = vpop.xlane.xlu1 %240 }
 0x14d   : > { %v244_v15 = vmul.f32 0.03125, %v241_v12 }
 0x14f   : > { %247 = vst.msk [vmem:[%s218_s10 + $0x8] sm:$0xff] %vm245_vm9, %v244_v15 }
 0x150 PF: > { %s1657_s17 = sld [smem:[#allocation13_spill]] }
 0x151   : > { %s1658_s21 = sld [smem:[#allocation11_spill]] }
 0x156   : > { %p702_p10 = scmp.ge.s32.totalorder %s1657_s17, 2 }
 0x157   : > { %s585_s3 = sand.u32 1, %s1658_s21  }
 0x158   : > { %p699_p11 = pnand %p702_p10, %p933_p7  ;;  %s586_s19 = scalar_lea.sflag [#allocation8], %s585_s3 }
 0x15a   : > { %p700_p6 = pneg %p699_p11 }
 0x15c   : > { %822 = dma.done.wait (%p700_p6), %s586_s19, 64  }
 0x15d   : > { %824 = vsyncadd (%p700_p6), %s586_s19, 4294967232  ;;  %s1660_s12 = sld [smem:[#allocation14_spill]]  ;;  %s1663_s10 = smov %s831_s11 }
 0x15e   : > { %s1661_s22 = sld [smem:[#allocation12_spill]] }
 0x15f   : > { %s1662_s2 = sld [smem:[#allocation15_spill]] }
 0x163   : > { %p31_p12 = scmp.ge.s32.totalorder %s1660_s12, 4  }
 0x164   : > { %s1664_s11 = smov %s1661_s22 }
 0x165   :  { %33 = sbr.rel (!%p31_p12) target bundleno = 39 (0x27), region = 86 }
 0x16a   :  { %599 = vsyncpa [#allocation8], 1 }
 0x16b   :  { %601 = vsyncpa [#allocation8 + $0x1], 1 }

</bundles_post_ra>
